<compile_context>
chip_gen: v7x
topology: tpu7x:2x2x1
jax: 0.10.0
libtpu: 0.0.40
codegen_flags: <defaults>
</compile_context>

<pallas_src>
import math
import functools

import jax
import jax.numpy as jnp
from jax.experimental import pallas as pl
from jax.experimental.pallas import tpu as pltpu

# ---- model hyper-parameters (consistent with the PyTorch module) ------------
# cfg.obs_size[cfg.env_type] = (4, 16, 16) -> D_in = 1024
# num_neurons=32 -> hidden = 32*4 = 128 ; n_layers=2 -> 2*2 = 4 hidden layers
# cfg.action_size[cfg.env_type] = 8
OBS_SHAPE = (4, 16, 16)
D_IN = math.prod(OBS_SHAPE)      # 1024
HIDDEN = 32 * 4                  # 128
N_HIDDEN_LAYERS = 2 * 2          # 4
ACTION_SIZE = 8
BATCH = 2
OUT_WIDTH = 128                  # lane-dense fused head (policy lanes 0..7, value lane 8)


def _gelu_exact(x):
    # matches torch.nn.functional.gelu default (erf-based, not tanh approx)
    return 0.5 * x * (1.0 + jax.lax.erf(x * (1.0 / jnp.sqrt(2.0).astype(x.dtype))))


def _mlp_kernel(n_hidden, x_ref, w_in_ref, w_hid_ref, b_ref, w_head_ref, out_ref):
    """One batch-row tile: input linear + GELU, n_hidden hidden linears + GELU,
    fused (policy|value) head, masked softmax + tanh, single lane-dense store."""
    # in-kernel bf16 cast of the streamed activation tile (x arrives as f32)
    x = x_ref[...].astype(jnp.bfloat16)                              # [TM, D_IN]

    b = b_ref[...]                                                   # [NH+2, 128] f32

    # input layer (bf16 operands, f32 accumulate + f32 elementwise -> safe on v5e)
    out = jnp.dot(x, w_in_ref[...], preferred_element_type=jnp.float32) + b[0:1, :]
    out = _gelu_exact(out)

    # hidden layers (static Python loop -> fully unrolled at trace time)
    for i in range(n_hidden):
        out = jnp.dot(out.astype(jnp.bfloat16), w_hid_ref[i],
                      preferred_element_type=jnp.float32) + b[i + 1:i + 2, :]
        out = _gelu_exact(out)

    # fused policy+value head: one [128,128] matmul; lanes 0..7 = policy logits,
    # lane 8 = value pre-activation, lanes 9..127 = 0 (zero weights/bias)
    head = jnp.dot(out.astype(jnp.bfloat16), w_head_ref[...],
                   preferred_element_type=jnp.float32) + b[n_hidden + 1:n_hidden + 2, :]

    lane = jax.lax.broadcasted_iota(jnp.int32, head.shape, 1)
    is_policy = lane < ACTION_SIZE
    is_value = lane == ACTION_SIZE

    # masked softmax over the policy lanes (finite mask -> no -inf/NaN hazards)
    masked = jnp.where(is_policy, head, -1e30)
    m = jnp.max(masked, axis=-1, keepdims=True)
    e = jnp.exp(masked - m)                                          # padded lanes underflow to 0
    inv = 1.0 / jnp.sum(e, axis=-1, keepdims=True)                   # exact normalization, [TM,1]
    policy = e * inv

    # lane 8 carries tanh(value); everything else carries softmax (0 beyond lane 8)
    out_ref[...] = jnp.where(is_value, jnp.tanh(head), policy).astype(out_ref.dtype)


def _default_tile_m():
    """128 rows fills a v5e 128x128 MXU; 256 fills the v6e/v7x 256-row MXU."""
    try:
        kind = jax.devices()[0].device_kind.lower()
        if "v5" in kind:
            return 128
    except Exception:
        pass
    return 256


def simple_model_forward(x, kparams, tile_m=None):
    """x: [B, C, H, W] float32 (NCHW).  Returns (policy [B, A], value [B, 1])."""
    if x.ndim > 3:
        x2d = x.reshape(x.shape[0], -1)          # torch.flatten(x, 1)
    else:
        x2d = x.reshape(1, -1)                   # torch.flatten(x) -> single row
    B = x2d.shape[0]

    w_in, w_hid, b_all, w_head = kparams
    n_hidden = w_hid.shape[0]

    # Pick the batch tile: large for throughput, shrunk (sublane-aligned) for small B.
    if tile_m is None:
        tile_m = _default_tile_m()
    tile_m = min(tile_m, max(8, ((B + 7) // 8) * 8))
    b_pad = int(pl.cdiv(B, tile_m)) * tile_m
    if b_pad != B:
        x2d = jnp.concatenate(
            [x2d, jnp.zeros((b_pad - B, D_IN), x2d.dtype)], axis=0)
    grid = (b_pad // tile_m,)

    # advisory cost estimate so XLA schedules the surrounding rollout ops around us
    flops = 2 * b_pad * (D_IN * HIDDEN + n_hidden * HIDDEN * HIDDEN + HIDDEN * OUT_WIDTH)
    transcendentals = b_pad * ((1 + n_hidden) * HIDDEN + 2 * OUT_WIDTH)
    weight_bytes = ((D_IN * HIDDEN + n_hidden * HIDDEN * HIDDEN + HIDDEN * OUT_WIDTH) * 2
                    + (n_hidden + 2) * HIDDEN * 4)
    bytes_accessed = b_pad * D_IN * 4 + weight_bytes + b_pad * OUT_WIDTH * 4

    kernel = functools.partial(_mlp_kernel, n_hidden)

    out = pl.pallas_call(
        kernel,
        out_shape=jax.ShapeDtypeStruct((b_pad, OUT_WIDTH), jnp.float32),
        grid=grid,
        in_specs=[
            # x streams row-tiles through the pipeline
            pl.BlockSpec((tile_m, D_IN), lambda i: (i, 0)),
            # weights/biases: constant index_maps -> VMEM-resident across all grid steps
            pl.BlockSpec((D_IN, HIDDEN), lambda i: (0, 0)),
            pl.BlockSpec((n_hidden, HIDDEN, HIDDEN), lambda i: (0, 0, 0)),
            pl.BlockSpec((n_hidden + 2, HIDDEN), lambda i: (0, 0)),
            pl.BlockSpec((HIDDEN, OUT_WIDTH), lambda i: (0, 0)),
        ],
        out_specs=pl.BlockSpec((tile_m, OUT_WIDTH), lambda i: (i, 0)),
        compiler_params=pltpu.CompilerParams(
            dimension_semantics=("parallel",),   # shards batch across v7x's 2 TCs
            vmem_limit_bytes=32 << 20,
        ),
        cost_estimate=pl.CostEstimate(
            flops=flops, transcendentals=transcendentals, bytes_accessed=bytes_accessed),
    )(x2d, w_in, w_hid, b_all, w_head)

    policy = out[:B, :ACTION_SIZE]
    value = out[:B, ACTION_SIZE:ACTION_SIZE + 1]
    return policy, value


def init_params(key):
    """Deterministic f32 init mimicking nn.Linear's uniform(-1/sqrt(fan_in), +)."""
    def linear(key, fan_in, fan_out):
        kw, kb = jax.random.split(key)
        bound = 1.0 / math.sqrt(fan_in)
        w = jax.random.uniform(kw, (fan_in, fan_out), jnp.float32, -bound, bound)
        b = jax.random.uniform(kb, (1, fan_out), jnp.float32, -bound, bound)
        return w, b

    keys = jax.random.split(key, N_HIDDEN_LAYERS + 3)
    input_l = linear(keys[0], D_IN, HIDDEN)
    hidden = [linear(keys[1 + i], HIDDEN, HIDDEN) for i in range(N_HIDDEN_LAYERS)]
    policy_h = linear(keys[1 + N_HIDDEN_LAYERS], HIDDEN, ACTION_SIZE)
    value_h = linear(keys[2 + N_HIDDEN_LAYERS], HIDDEN, 1)
    return input_l, hidden, policy_h, value_h


def pack_kernel_params(params):
    """Stack/fuse the f32 master params into the kernel's 4 bf16/f32 tensors."""
    (w_in, b_in), hidden, (w_p, b_p), (w_v, b_v) = params

    w_hid = jnp.stack([w for (w, _) in hidden], axis=0)              # [NH, 128, 128]

    w_head = jnp.zeros((HIDDEN, OUT_WIDTH), jnp.float32)
    w_head = w_head.at[:, :ACTION_SIZE].set(w_p)
    w_head = w_head.at[:, ACTION_SIZE:ACTION_SIZE + 1].set(w_v)      # [128, 128]

    b_head = jnp.zeros((1, OUT_WIDTH), jnp.float32)
    b_head = b_head.at[:, :ACTION_SIZE].set(b_p)
    b_head = b_head.at[:, ACTION_SIZE:ACTION_SIZE + 1].set(b_v)      # [1, 128]

    # single 2-D bias slab: one (8,128)-padded VMEM tile, unmasked loads
    b_all = jnp.concatenate(
        [b_in] + [b for (_, b) in hidden] + [b_head], axis=0)        # [NH+2, 128]

    return (w_in.astype(jnp.bfloat16),
            w_hid.astype(jnp.bfloat16),
            b_all.astype(jnp.float32),
            w_head.astype(jnp.bfloat16))


def reference_forward(x, params):
    """Pure-JAX f32 reference (exact PyTorch semantics) for correctness checking."""
    if x.ndim > 3:
        out = x.reshape(x.shape[0], -1)
    else:
        out = x.reshape(1, -1)
    (w_in, b_in), hidden, (w_p, b_p), (w_v, b_v) = params
    out = jax.nn.gelu(out @ w_in + b_in, approximate=False)
    for (w, b) in hidden:
        out = jax.nn.gelu(out @ w + b, approximate=False)
    policy = jax.nn.softmax(out @ w_p + b_p, axis=-1)
    value = jnp.tanh(out @ w_v + b_v)
    return policy, value


if __name__ == "__main__":
    key = jax.random.PRNGKey(0)
    k_x, k_p = jax.random.split(key)

    x = jax.random.normal(k_x, (BATCH,) + OBS_SHAPE, dtype=jnp.float32)  # NCHW
    params = init_params(k_p)
    kparams = pack_kernel_params(params)

    policy, value = simple_model_forward(x, kparams)
    policy, value = jax.block_until_ready((policy, value))

    ref_policy, ref_value = reference_forward(x, params)
    assert policy.shape == (BATCH, ACTION_SIZE) and value.shape == (BATCH, 1)
    # bf16 weight storage -> looser tolerance vs the f32 reference
    assert jnp.allclose(policy, ref_policy, atol=2e-2, rtol=2e-2)
    assert jnp.allclose(value, ref_value, atol=2e-2, rtol=2e-2)

    print("KERNEL_OK")
</pallas_src>

<mosaic_0001>
module attributes {stable_mosaic.version = 11 : i64} {
  func.func @_mlp_kernel(%arg0: i32, %arg1: memref<8x1024xf32, #tpu.memory_space<vmem>>, %arg2: memref<1024x128xbf16, #tpu.memory_space<vmem>>, %arg3: memref<4x128x128xbf16, #tpu.memory_space<vmem>>, %arg4: memref<6x128xf32, #tpu.memory_space<vmem>>, %arg5: memref<128x128xbf16, #tpu.memory_space<vmem>>, %arg6: memref<8x128xf32, #tpu.memory_space<vmem>>) attributes {dimension_semantics = [#tpu.dimension_semantics<parallel>], iteration_bounds = array<i64: 1>, scalar_prefetch = 0 : i64, scratch_operands = 0 : i64, tpu.core_type = #tpu.core_type<tc>, window_params = [{transform_indices = @transform_0, window_bounds = array<i64: 8, 1024>}, {pipeline_mode = #tpu.pipeline_mode<synchronous>, transform_indices = @transform_1, window_bounds = array<i64: 1024, 128>}, {pipeline_mode = #tpu.pipeline_mode<synchronous>, transform_indices = @transform_2, window_bounds = array<i64: 4, 128, 128>}, {pipeline_mode = #tpu.pipeline_mode<synchronous>, transform_indices = @transform_3, window_bounds = array<i64: 6, 128>}, {pipeline_mode = #tpu.pipeline_mode<synchronous>, transform_indices = @transform_4, window_bounds = array<i64: 128, 128>}, {transform_indices = @transform_5, window_bounds = array<i64: 8, 128>}]} {
    %c0 = arith.constant 0 : index
    %c0_0 = arith.constant 0 : index
    %0 = vector.load %arg1[%c0, %c0_0] : memref<8x1024xf32, #tpu.memory_space<vmem>>, vector<8x1024xf32>
    %1 = arith.truncf %0 : vector<8x1024xf32> to vector<8x1024xbf16>
    %c0_1 = arith.constant 0 : index
    %c0_2 = arith.constant 0 : index
    %2 = vector.load %arg4[%c0_1, %c0_2] : memref<6x128xf32, #tpu.memory_space<vmem>>, vector<6x128xf32>
    %c0_3 = arith.constant 0 : index
    %c0_4 = arith.constant 0 : index
    %3 = vector.load %arg2[%c0_3, %c0_4] : memref<1024x128xbf16, #tpu.memory_space<vmem>>, vector<1024x128xbf16>
    %cst = arith.constant dense<0.000000e+00> : vector<8x128xf32>
    %4 = tpu.matmul %1, %3, %cst {dimension_numbers = #tpu.dot_dimension_numbers<[1], [0], [0], [1], [0, 0, 1, 1], [], []>} : vector<8x1024xbf16>, vector<1024x128xbf16>, vector<8x128xf32> -> vector<8x128xf32>
    %5 = vector.extract_strided_slice %2 {offsets = [0, 0], sizes = [1, 128], strides = [1, 1]} : vector<6x128xf32> to vector<1x128xf32>
    %6 = vector.broadcast %5 : vector<1x128xf32> to vector<8x128xf32>
    %7 = arith.addf %4, %6 : vector<8x128xf32>
    %cst_5 = arith.constant 5.000000e-01 : f32
    %8 = vector.broadcast %cst_5 : f32 to vector<8x128xf32>
    %9 = arith.mulf %8, %7 : vector<8x128xf32>
    %cst_6 = arith.constant 2.000000e+00 : f32
    %10 = math.sqrt %cst_6 : f32
    %cst_7 = arith.constant 1.000000e+00 : f32
    %11 = arith.divf %cst_7, %10 : f32
    %12 = vector.broadcast %11 : f32 to vector<8x128xf32>
    %13 = arith.mulf %7, %12 : vector<8x128xf32>
    %14 = math.erf %13 : vector<8x128xf32>
    %cst_8 = arith.constant 1.000000e+00 : f32
    %15 = vector.broadcast %cst_8 : f32 to vector<8x128xf32>
    %16 = arith.addf %15, %14 : vector<8x128xf32>
    %17 = arith.mulf %9, %16 : vector<8x128xf32>
    %18 = arith.truncf %17 : vector<8x128xf32> to vector<8x128xbf16>
    %c0_9 = arith.constant 0 : index
    %c0_10 = arith.constant 0 : index
    %c0_11 = arith.constant 0 : index
    %19 = vector.load %arg3[%c0_9, %c0_10, %c0_11] : memref<4x128x128xbf16, #tpu.memory_space<vmem>>, vector<1x128x128xbf16>
    %20 = vector.shape_cast %19 : vector<1x128x128xbf16> to vector<128x128xbf16>
    %cst_12 = arith.constant dense<0.000000e+00> : vector<8x128xf32>
    %21 = tpu.matmul %18, %20, %cst_12 {dimension_numbers = #tpu.dot_dimension_numbers<[1], [0], [0], [1], [0, 0, 1, 1], [], []>} : vector<8x128xbf16>, vector<128x128xbf16>, vector<8x128xf32> -> vector<8x128xf32>
    %22 = vector.extract_strided_slice %2 {offsets = [1, 0], sizes = [1, 128], strides = [1, 1]} : vector<6x128xf32> to vector<1x128xf32>
    %23 = vector.broadcast %22 : vector<1x128xf32> to vector<8x128xf32>
    %24 = arith.addf %21, %23 : vector<8x128xf32>
    %cst_13 = arith.constant 5.000000e-01 : f32
    %25 = vector.broadcast %cst_13 : f32 to vector<8x128xf32>
    %26 = arith.mulf %25, %24 : vector<8x128xf32>
    %cst_14 = arith.constant 2.000000e+00 : f32
    %27 = math.sqrt %cst_14 : f32
    %cst_15 = arith.constant 1.000000e+00 : f32
    %28 = arith.divf %cst_15, %27 : f32
    %29 = vector.broadcast %28 : f32 to vector<8x128xf32>
    %30 = arith.mulf %24, %29 : vector<8x128xf32>
    %31 = math.erf %30 : vector<8x128xf32>
    %cst_16 = arith.constant 1.000000e+00 : f32
    %32 = vector.broadcast %cst_16 : f32 to vector<8x128xf32>
    %33 = arith.addf %32, %31 : vector<8x128xf32>
    %34 = arith.mulf %26, %33 : vector<8x128xf32>
    %35 = arith.truncf %34 : vector<8x128xf32> to vector<8x128xbf16>
    %c1 = arith.constant 1 : index
    %c0_17 = arith.constant 0 : index
    %c0_18 = arith.constant 0 : index
    %36 = vector.load %arg3[%c1, %c0_17, %c0_18] : memref<4x128x128xbf16, #tpu.memory_space<vmem>>, vector<1x128x128xbf16>
    %37 = vector.shape_cast %36 : vector<1x128x128xbf16> to vector<128x128xbf16>
    %cst_19 = arith.constant dense<0.000000e+00> : vector<8x128xf32>
    %38 = tpu.matmul %35, %37, %cst_19 {dimension_numbers = #tpu.dot_dimension_numbers<[1], [0], [0], [1], [0, 0, 1, 1], [], []>} : vector<8x128xbf16>, vector<128x128xbf16>, vector<8x128xf32> -> vector<8x128xf32>
    %39 = vector.extract_strided_slice %2 {offsets = [2, 0], sizes = [1, 128], strides = [1, 1]} : vector<6x128xf32> to vector<1x128xf32>
    %40 = vector.broadcast %39 : vector<1x128xf32> to vector<8x128xf32>
    %41 = arith.addf %38, %40 : vector<8x128xf32>
    %cst_20 = arith.constant 5.000000e-01 : f32
    %42 = vector.broadcast %cst_20 : f32 to vector<8x128xf32>
    %43 = arith.mulf %42, %41 : vector<8x128xf32>
    %cst_21 = arith.constant 2.000000e+00 : f32
    %44 = math.sqrt %cst_21 : f32
    %cst_22 = arith.constant 1.000000e+00 : f32
    %45 = arith.divf %cst_22, %44 : f32
    %46 = vector.broadcast %45 : f32 to vector<8x128xf32>
    %47 = arith.mulf %41, %46 : vector<8x128xf32>
    %48 = math.erf %47 : vector<8x128xf32>
    %cst_23 = arith.constant 1.000000e+00 : f32
    %49 = vector.broadcast %cst_23 : f32 to vector<8x128xf32>
    %50 = arith.addf %49, %48 : vector<8x128xf32>
    %51 = arith.mulf %43, %50 : vector<8x128xf32>
    %52 = arith.truncf %51 : vector<8x128xf32> to vector<8x128xbf16>
    %c2 = arith.constant 2 : index
    %c0_24 = arith.constant 0 : index
    %c0_25 = arith.constant 0 : index
    %53 = vector.load %arg3[%c2, %c0_24, %c0_25] : memref<4x128x128xbf16, #tpu.memory_space<vmem>>, vector<1x128x128xbf16>
    %54 = vector.shape_cast %53 : vector<1x128x128xbf16> to vector<128x128xbf16>
    %cst_26 = arith.constant dense<0.000000e+00> : vector<8x128xf32>
    %55 = tpu.matmul %52, %54, %cst_26 {dimension_numbers = #tpu.dot_dimension_numbers<[1], [0], [0], [1], [0, 0, 1, 1], [], []>} : vector<8x128xbf16>, vector<128x128xbf16>, vector<8x128xf32> -> vector<8x128xf32>
    %56 = vector.extract_strided_slice %2 {offsets = [3, 0], sizes = [1, 128], strides = [1, 1]} : vector<6x128xf32> to vector<1x128xf32>
    %57 = vector.broadcast %56 : vector<1x128xf32> to vector<8x128xf32>
    %58 = arith.addf %55, %57 : vector<8x128xf32>
    %cst_27 = arith.constant 5.000000e-01 : f32
    %59 = vector.broadcast %cst_27 : f32 to vector<8x128xf32>
    %60 = arith.mulf %59, %58 : vector<8x128xf32>
    %cst_28 = arith.constant 2.000000e+00 : f32
    %61 = math.sqrt %cst_28 : f32
    %cst_29 = arith.constant 1.000000e+00 : f32
    %62 = arith.divf %cst_29, %61 : f32
    %63 = vector.broadcast %62 : f32 to vector<8x128xf32>
    %64 = arith.mulf %58, %63 : vector<8x128xf32>
    %65 = math.erf %64 : vector<8x128xf32>
    %cst_30 = arith.constant 1.000000e+00 : f32
    %66 = vector.broadcast %cst_30 : f32 to vector<8x128xf32>
    %67 = arith.addf %66, %65 : vector<8x128xf32>
    %68 = arith.mulf %60, %67 : vector<8x128xf32>
    %69 = arith.truncf %68 : vector<8x128xf32> to vector<8x128xbf16>
    %c3 = arith.constant 3 : index
    %c0_31 = arith.constant 0 : index
    %c0_32 = arith.constant 0 : index
    %70 = vector.load %arg3[%c3, %c0_31, %c0_32] : memref<4x128x128xbf16, #tpu.memory_space<vmem>>, vector<1x128x128xbf16>
    %71 = vector.shape_cast %70 : vector<1x128x128xbf16> to vector<128x128xbf16>
    %cst_33 = arith.constant dense<0.000000e+00> : vector<8x128xf32>
    %72 = tpu.matmul %69, %71, %cst_33 {dimension_numbers = #tpu.dot_dimension_numbers<[1], [0], [0], [1], [0, 0, 1, 1], [], []>} : vector<8x128xbf16>, vector<128x128xbf16>, vector<8x128xf32> -> vector<8x128xf32>
    %73 = vector.extract_strided_slice %2 {offsets = [4, 0], sizes = [1, 128], strides = [1, 1]} : vector<6x128xf32> to vector<1x128xf32>
    %74 = vector.broadcast %73 : vector<1x128xf32> to vector<8x128xf32>
    %75 = arith.addf %72, %74 : vector<8x128xf32>
    %cst_34 = arith.constant 5.000000e-01 : f32
    %76 = vector.broadcast %cst_34 : f32 to vector<8x128xf32>
    %77 = arith.mulf %76, %75 : vector<8x128xf32>
    %cst_35 = arith.constant 2.000000e+00 : f32
    %78 = math.sqrt %cst_35 : f32
    %cst_36 = arith.constant 1.000000e+00 : f32
    %79 = arith.divf %cst_36, %78 : f32
    %80 = vector.broadcast %79 : f32 to vector<8x128xf32>
    %81 = arith.mulf %75, %80 : vector<8x128xf32>
    %82 = math.erf %81 : vector<8x128xf32>
    %cst_37 = arith.constant 1.000000e+00 : f32
    %83 = vector.broadcast %cst_37 : f32 to vector<8x128xf32>
    %84 = arith.addf %83, %82 : vector<8x128xf32>
    %85 = arith.mulf %77, %84 : vector<8x128xf32>
    %86 = arith.truncf %85 : vector<8x128xf32> to vector<8x128xbf16>
    %c0_38 = arith.constant 0 : index
    %c0_39 = arith.constant 0 : index
    %87 = vector.load %arg5[%c0_38, %c0_39] : memref<128x128xbf16, #tpu.memory_space<vmem>>, vector<128x128xbf16>
    %cst_40 = arith.constant dense<0.000000e+00> : vector<8x128xf32>
    %88 = tpu.matmul %86, %87, %cst_40 {dimension_numbers = #tpu.dot_dimension_numbers<[1], [0], [0], [1], [0, 0, 1, 1], [], []>} : vector<8x128xbf16>, vector<128x128xbf16>, vector<8x128xf32> -> vector<8x128xf32>
    %89 = vector.extract_strided_slice %2 {offsets = [5, 0], sizes = [1, 128], strides = [1, 1]} : vector<6x128xf32> to vector<1x128xf32>
    %90 = vector.broadcast %89 : vector<1x128xf32> to vector<8x128xf32>
    %91 = arith.addf %88, %90 : vector<8x128xf32>
    %92 = tpu.iota {dimensions = array<i32: 1>} : vector<8x128xi32>
    %c8_i32 = arith.constant 8 : i32
    %93 = vector.broadcast %c8_i32 : i32 to vector<8x128xi32>
    %94 = arith.cmpi slt, %92, %93 : vector<8x128xi32>
    %c8_i32_41 = arith.constant 8 : i32
    %95 = vector.broadcast %c8_i32_41 : i32 to vector<8x128xi32>
    %96 = arith.cmpi eq, %92, %95 : vector<8x128xi32>
    %cst_42 = arith.constant -1.000000e+30 : f32
    %97 = vector.broadcast %cst_42 : f32 to vector<8x128xf32>
    %98 = arith.select %94, %91, %97 : vector<8x128xi1>, vector<8x128xf32>
    %cst_43 = arith.constant dense<0xFF800000> : vector<8xf32>
    %99 = vector.multi_reduction <maximumf>, %98, %cst_43 [1] : vector<8x128xf32> to vector<8xf32>
    %100 = vector.shape_cast %99 : vector<8xf32> to vector<8x1xf32>
    %101 = vector.broadcast %100 : vector<8x1xf32> to vector<8x128xf32>
    %102 = arith.subf %98, %101 : vector<8x128xf32>
    %103 = math.exp %102 : vector<8x128xf32>
    %cst_44 = arith.constant dense<0.000000e+00> : vector<8xf32>
    %104 = vector.multi_reduction <add>, %103, %cst_44 [1] : vector<8x128xf32> to vector<8xf32>
    %105 = vector.shape_cast %104 : vector<8xf32> to vector<8x1xf32>
    %cst_45 = arith.constant 1.000000e+00 : f32
    %106 = vector.broadcast %cst_45 : f32 to vector<8x1xf32>
    %107 = arith.divf %106, %105 : vector<8x1xf32>
    %108 = vector.broadcast %107 : vector<8x1xf32> to vector<8x128xf32>
    %109 = arith.mulf %103, %108 : vector<8x128xf32>
    %110 = math.tanh %91 : vector<8x128xf32>
    %111 = arith.select %96, %110, %109 : vector<8x128xi1>, vector<8x128xf32>
    %c0_46 = arith.constant 0 : index
    %c0_47 = arith.constant 0 : index
    %112 = vector.load %arg6[%c0_46, %c0_47] : memref<8x128xf32, #tpu.memory_space<vmem>>, vector<8x128xf32>
    tpu.vector_store %arg6[%c0_46, %c0_47], %111 {strides = array<i32>} : memref<8x128xf32, #tpu.memory_space<vmem>>, vector<8x128xf32>,
    return
  }
  func.func @transform_0(%arg0: i32) -> (i32, i32) {
    %c0_i32 = arith.constant 0 : i32
    %c0_i32_0 = arith.constant 0 : i32
    return %arg0, %c0_i32 : i32, i32
  }
  func.func @transform_1(%arg0: i32) -> (i32, i32) {
    %c0_i32 = arith.constant 0 : i32
    %c0_i32_0 = arith.constant 0 : i32
    %c0_i32_1 = arith.constant 0 : i32
    return %c0_i32, %c0_i32_0 : i32, i32
  }
  func.func @transform_2(%arg0: i32) -> (i32, i32, i32) {
    %c0_i32 = arith.constant 0 : i32
    %c0_i32_0 = arith.constant 0 : i32
    %c0_i32_1 = arith.constant 0 : i32
    %c0_i32_2 = arith.constant 0 : i32
    return %c0_i32, %c0_i32_0, %c0_i32_1 : i32, i32, i32
  }
  func.func @transform_3(%arg0: i32) -> (i32, i32) {
    %c0_i32 = arith.constant 0 : i32
    %c0_i32_0 = arith.constant 0 : i32
    %c0_i32_1 = arith.constant 0 : i32
    return %c0_i32, %c0_i32_0 : i32, i32
  }
  func.func @transform_4(%arg0: i32) -> (i32, i32) {
    %c0_i32 = arith.constant 0 : i32
    %c0_i32_0 = arith.constant 0 : i32
    %c0_i32_1 = arith.constant 0 : i32
    return %c0_i32, %c0_i32_0 : i32, i32
  }
  func.func @transform_5(%arg0: i32) -> (i32, i32) {
    %c0_i32 = arith.constant 0 : i32
    %c0_i32_0 = arith.constant 0 : i32
    return %arg0, %c0_i32 : i32, i32
  }
}

</mosaic_0001>

<bundles_post_ra>
// kernel: tpu_custom_call.1
= control target key start
LH: loop header
LB: loop body
LE: loop exit
PB: predicated region body
PF: predicated region fallthrough
CT: control target
= control target key end

     0   :  { %10 = vsyncpa [#allocation3], 0  ;;  %s2139_s0 = inlined_call_operand.hbm [shape: f32[8,1024], index: 0, kind: input, shape index: {}]   ;;  %s2140_s1 = inlined_call_operand.hbm [shape: bf16[1024,128], index: 1, kind: input, shape index: {}]   ;;  %s2141_s2 = inlined_call_operand.hbm [shape: bf16[4,128,128], index: 2, kind: input, shape index: {}]   ;;  %s2142_s3 = inlined_call_operand.vmem [shape: f32[6,128], index: 3, kind: input, shape index: {}]   ;;  %s2143_s4 = inlined_call_operand.hbm [shape: bf16[128,128], index: 4, kind: input, shape index: {}]   ;;  %s2144_s5 = inlined_call_operand.hbm [shape: f32[8,128], index: 5, kind: output, shape index: {}]  }
   0x1   :  { %11 = vsyncpa [#allocation6], 0 }
   0x2   :  { %12 = vsyncpa [#allocation9], 0 }
   0x3   :  { %13 = vsyncpa [#allocation4], 0  ;;  %s1960_s18 = smov [#allocation5]   ;;  %s1842_s22 = scalar_lea.hbm %s2140_s1, 8192 }
   0x4   :  { %s29_s19 = sshll.u32 %s1960_s18, 4  ;;  %p1843_p0 = scmp.ne.s32.totalorder %s2140_s1, %s1842_s22  ;;  %s30_s19 = int_to_ptr.vmem [resolvable:$true] %s29_s19 }
   0x5   :  { %p1846_p1 = scmp.lt.u32.totalorder %s1842_s22, %s2140_s1 }
   0x7   :  { %p1848_p2 = pnand %p1846_p1, %p1843_p0 }
   0x9   :  { %1851 = shalt.err (!%p1848_p2)
}
   0xa   :  { %s1852_s27 = scalar_lea.vmem %s30_s19, 8192  ;;  %p1857_p4 = scmp.lt.s32.totalorder %s30_s19, %s30_s19 }
   0xb   :  { %p1853_p3 = scmp.ne.s32.totalorder %s30_s19, %s1852_s27  ;;  %p1858_p5 = scmp.lt.s32.totalorder %s1852_s27, %s1852_s27 }
   0xd   :  { %p1859_p6 = por %p1858_p5, %p1857_p4 }
   0xf   :  { %p1860_p7 = pnand %p1859_p6, %p1853_p3 }
  0x11   :  { %1863 = shalt.err (!%p1860_p7)
}
  0x12   :  { %s1961_s28 = smov 64   ;;  %s1962_s29 = smov 4  }
  0x13   :  { %35 = dma.hbm_to_vmem [thread:$0]  %s2140_s1, 8192, %s30_s19, [#allocation6], %s1961_s28, %s1961_s28, %s1962_s29  }
  0x14   :  { %s1963_s7 = smov [#allocation2]   ;;  %s1964_s9 = smov [#allocation7]  }
  0x15   :  { %s20_s8 = sshll.u32 %s1963_s7, 4  ;;  %s41_s10 = sshll.u32 %s1964_s9, 4  ;;  %s21_s8 = int_to_ptr.vmem [resolvable:$true] %s20_s8  ;;  %s42_s10 = int_to_ptr.vmem [resolvable:$true] %s41_s10 }
  0x16   :  { %s1864_s13 = scalar_lea.hbm %s2139_s0, 1024 }
  0x17   :  { %p1865_p8 = scmp.ne.s32.totalorder %s2139_s0, %s1864_s13  ;;  %p1868_p9 = scmp.lt.u32.totalorder %s1864_s13, %s2139_s0 }
  0x19   :  { %p1870_p10 = pnand %p1868_p9, %p1865_p8 }
  0x1b   :  { %1873 = shalt.err (!%p1870_p10)
}
  0x1c   :  { %s1874_s1 = scalar_lea.vmem %s21_s8, 1024  ;;  %p1879_p12 = scmp.lt.s32.totalorder %s21_s8, %s21_s8 }
  0x1d   :  { %p1875_p11 = scmp.ne.s32.totalorder %s21_s8, %s1874_s1  ;;  %p1880_p13 = scmp.lt.s32.totalorder %s1874_s1, %s1874_s1 }
  0x1f   :  { %p1881_p0 = por %p1880_p13, %p1879_p12 }
  0x21   :  { %p1882_p1 = pnand %p1881_p0, %p1875_p11 }
  0x23   :  { %1885 = shalt.err (!%p1882_p1)
}
  0x24   :  { %23 = dma.hbm_to_vmem [thread:$0]  %s2139_s0, 1024, %s21_s8, [#allocation3]  }
  0x25   :  { %s1886_s22 = scalar_lea.hbm %s2141_s2, 4096 }
  0x26   :  { %p1887_p2 = scmp.ne.s32.totalorder %s2141_s2, %s1886_s22  ;;  %p1890_p3 = scmp.lt.u32.totalorder %s1886_s22, %s2141_s2 }
  0x28   :  { %p1892_p4 = pnand %p1890_p3, %p1887_p2 }
  0x2a   :  { %1895 = shalt.err (!%p1892_p4)
}
  0x2b   :  { %s1896_s27 = scalar_lea.vmem %s42_s10, 4096  ;;  %p1901_p6 = scmp.lt.s32.totalorder %s42_s10, %s42_s10 }
  0x2c   :  { %p1897_p5 = scmp.ne.s32.totalorder %s42_s10, %s1896_s27  ;;  %p1902_p7 = scmp.lt.s32.totalorder %s1896_s27, %s1896_s27 }
  0x2e   :  { %p1903_p8 = por %p1902_p7, %p1901_p6 }
  0x30   :  { %p1904_p9 = pnand %p1903_p8, %p1897_p5 }
  0x32   :  { %1907 = shalt.err (!%p1904_p9)
}
  0x33   :  { %47 = dma.hbm_to_vmem [thread:$0]  %s2141_s2, 4096, %s42_s10, [#allocation6], %s1961_s28, %s1961_s28, %s1962_s29  }
  0x34   :  { %s1965_s6 = smov [#allocation8]   ;;  %s1908_s11 = scalar_lea.hbm %s2143_s4, 1024 }
  0x35   :  { %s55_s7 = sshll.u32 %s1965_s6, 4  ;;  %p1909_p10 = scmp.ne.s32.totalorder %s2143_s4, %s1908_s11  ;;  %s56_s7 = int_to_ptr.vmem [resolvable:$true] %s55_s7 }
  0x36   :  { %p1912_p11 = scmp.lt.u32.totalorder %s1908_s11, %s2143_s4 }
  0x38   :  { %p1914_p12 = pnand %p1912_p11, %p1909_p10 }
  0x3a   :  { %1917 = shalt.err (!%p1914_p12)
}
  0x3b   :  { %s1918_s16 = scalar_lea.vmem %s56_s7, 1024  ;;  %p1923_p0 = scmp.lt.s32.totalorder %s56_s7, %s56_s7 }
  0x3c   :  { %p1919_p13 = scmp.ne.s32.totalorder %s56_s7, %s1918_s16  ;;  %p1924_p1 = scmp.lt.s32.totalorder %s1918_s16, %s1918_s16 }
  0x3e   :  { %p1925_p2 = por %p1924_p1, %p1923_p0 }
  0x40   :  { %p1926_p3 = pnand %p1925_p2, %p1919_p13 }
  0x42   :  { %1929 = shalt.err (!%p1926_p3)
}
  0x43   :  { %61 = dma.hbm_to_vmem [thread:$0]  %s2143_s4, 1024, %s56_s7, [#allocation9], %s1961_s28, %s1961_s28, %s1962_s29  }
  0x44   :  { %1952 = dma.done.wait [#allocation3], 1024  }
  0x45   :  { %1953 = vsyncadd [#allocation3], 4294966272 }
  0x46   :  { %1954 = dma.done.wait [#allocation6], 12288  }
  0x47   :  { %1955 = vsyncadd [#allocation6], 4294955008 }
  0x48   :  { %1956 = dma.done.wait [#allocation9], 1024  }
  0x49   :  { %1957 = vsyncadd [#allocation9], 4294966272  ;;  %v1722_v0 = vld [vmem:[#allocation5 + $0x40] sm:$0xff]   ;;  %v1726_v4 = vld [vmem:[#allocation5 + $0x48] sm:$0xff]   ;;  %vm1967_vm0 = vmmov 0  }
  0x4a   :  { %v1723_v1 = vld [vmem:[#allocation5 + $0xc0] sm:$0xff]   ;;  %1480 = vmatprep.subr.bf16.mxu0 %v1722_v0  ;;  %v1727_v5 = vld [vmem:[#allocation5 + $0xc8] sm:$0xff]   ;;  %v1730_v8 = vld [vmem:[#allocation5 + $0x50] sm:$0xff]  }
  0x4b   :  { %v1724_v2 = vld [vmem:[#allocation5] sm:$0xff]   ;;  %1502 = vmatprep.subr.bf16.mxu1 %v1723_v1  ;;  %v1728_v6 = vld [vmem:[#allocation5 + $0x8] sm:$0xff]   ;;  %v1731_v9 = vld [vmem:[#allocation5 + $0xd0] sm:$0xff]  }
  0x4c   :  { %v1725_v3 = vld [vmem:[#allocation5 + $0x80] sm:$0xff]   ;;  %1481 = vmatpush3.bf16.msra.mxu0 %v1724_v2  ;;  %v1729_v7 = vld [vmem:[#allocation5 + $0x88] sm:$0xff]   ;;  %v1732_v10 = vld [vmem:[#allocation5 + $0x10] sm:$0xff]  }
  0x4d   :  { %1503 = vmatpush3.bf16.msra.mxu1 %v1725_v3  ;;  %1482 = vmatprep.subr.bf16.mxu0 %v1726_v4  ;;  %v1733_v11 = vld [vmem:[#allocation5 + $0x90] sm:$0xff]   ;;  %v1734_v12 = vld [vmem:[#allocation5 + $0x58] sm:$0xff]   ;;  %v1738_v16 = vld [vmem:[#allocation5 + $0x60] sm:$0xff]  }
  0x4e   :  { %1504 = vmatprep.subr.bf16.mxu1 %v1727_v5  ;;  %v1735_v13 = vld [vmem:[#allocation5 + $0xd8] sm:$0xff]   ;;  %v1739_v17 = vld [vmem:[#allocation5 + $0xe0] sm:$0xff]   ;;  %v1742_v20 = vld [vmem:[#allocation5 + $0x68] sm:$0xff]  }
  0x4f   :  { %v1736_v14 = vld [vmem:[#allocation5 + $0x18] sm:$0xff]   ;;  %v1740_v18 = vld [vmem:[#allocation5 + $0x20] sm:$0xff]   ;;  %v1743_v21 = vld [vmem:[#allocation5 + $0xe8] sm:$0xff]  }
  0x50   :  { %1483 = vmatpush3.bf16.msra.mxu0 %v1728_v6  ;;  %v1737_v15 = vld [vmem:[#allocation5 + $0x98] sm:$0xff]   ;;  %v1741_v19 = vld [vmem:[#allocation5 + $0xa0] sm:$0xff]   ;;  %v1744_v22 = vld [vmem:[#allocation5 + $0x28] sm:$0xff]  }
  0x51   :  { %1505 = vmatpush3.bf16.msra.mxu1 %v1729_v7  ;;  %1484 = vmatprep.subr.bf16.mxu0 %v1730_v8  ;;  %v1745_v23 = vld [vmem:[#allocation5 + $0xa8] sm:$0xff]   ;;  %v1746_v24 = vld [vmem:[#allocation5 + $0x70] sm:$0xff]   ;;  %v1750_v28 = vld [vmem:[#allocation5 + $0x78] sm:$0xff]  }
  0x52   :  { %1506 = vmatprep.subr.bf16.mxu1 %v1731_v9  ;;  %v1747_v25 = vld [vmem:[#allocation5 + $0xf0] sm:$0xff]   ;;  %v1751_v29 = vld [vmem:[#allocation5 + $0xf8] sm:$0xff]   ;;  %v76_v32 = vld [vmem:[#allocation2 + $0x8] sm:$0xff] }
  0x53   :  { %v1748_v26 = vld [vmem:[#allocation5 + $0x30] sm:$0xff]   ;;  %v1752_v30 = vld [vmem:[#allocation5 + $0x38] sm:$0xff]   ;;  %v75_v34 = vld [vmem:[#allocation2] sm:$0xff]  ;;  %v84_v35 = vpack.c.bf16 %v76_v32, %v76_v32 }
  0x54   :  { %1485 = vmatpush3.bf16.msra.mxu0 %v1732_v10  ;;  %v1749_v27 = vld [vmem:[#allocation5 + $0xb0] sm:$0xff]   ;;  %v1753_v31 = vld [vmem:[#allocation5 + $0xb8] sm:$0xff]   ;;  %v83_v37 = vpack.c.bf16 %v75_v34, %v75_v34  ;;  %v1754_v40 = vld [vmem:[#allocation5 + $0x140] sm:$0xff]  }
  0x55   :  { %1507 = vmatpush3.bf16.msra.mxu1 %v1733_v11  ;;  %1486 = vmatprep.subr.bf16.mxu0 %v1734_v12  ;;  %v78_v33 = vld [vmem:[#allocation2 + $0x18] sm:$0xff]  ;;  %v77_v38 = vld [vmem:[#allocation2 + $0x10] sm:$0xff]  ;;  %v1755_v41 = vld [vmem:[#allocation5 + $0x1c0] sm:$0xff]  }
  0x56   :  { %1508 = vmatprep.subr.bf16.mxu1 %v1735_v13  ;;  %v86_v36 = vpack.c.bf16 %v78_v33, %v78_v33  ;;  %v85_v39 = vpack.c.bf16 %v77_v38, %v77_v38  ;;  %640 = vmatprep.mubr.bf16.mxu0 %v84_v35  ;;  %v1756_v42 = vld [vmem:[#allocation5 + $0x100] sm:$0xff]   ;;  %v1758_v44 = vld [vmem:[#allocation5 + $0x148] sm:$0xff]   ;;  %v1762_v48 = vld [vmem:[#allocation5 + $0x150] sm:$0xff]  }
  0x57   :  { %v1757_v43 = vld [vmem:[#allocation5 + $0x180] sm:$0xff]   ;;  %v1759_v45 = vld [vmem:[#allocation5 + $0x1c8] sm:$0xff]   ;;  %v1763_v49 = vld [vmem:[#allocation5 + $0x1d0] sm:$0xff]  }
  0x58   :  { %1487 = vmatpush3.bf16.msra.mxu0 %v1736_v14  ;;  %680 = vmatprep.mubr.bf16.mxu1 %v86_v36  ;;  %v1760_v46 = vld [vmem:[#allocation5 + $0x108] sm:$0xff]   ;;  %v1764_v50 = vld [vmem:[#allocation5 + $0x110] sm:$0xff]   ;;  %v1766_v52 = vld [vmem:[#allocation5 + $0x158] sm:$0xff]  }
  0x59   :  { %1509 = vmatpush3.bf16.msra.mxu1 %v1737_v15  ;;  %1488 = vmatprep.subr.bf16.mxu0 %v1738_v16  ;;  %v1761_v47 = vld [vmem:[#allocation5 + $0x188] sm:$0xff]   ;;  %v1765_v51 = vld [vmem:[#allocation5 + $0x190] sm:$0xff]   ;;  %v1767_v53 = vld [vmem:[#allocation5 + $0x1d8] sm:$0xff]  }
  0x5a   :  { %1510 = vmatprep.subr.bf16.mxu1 %v1739_v17  ;;  %v1768_v54 = vld [vmem:[#allocation5 + $0x118] sm:$0xff]   ;;  %v1770_v56 = vld [vmem:[#allocation5 + $0x160] sm:$0xff]   ;;  %v1774_v60 = vld [vmem:[#allocation5 + $0x168] sm:$0xff]   ;;  %v1966_v17 = vmov 0.0  }
  0x5b   :  { %v1769_v55 = vld [vmem:[#allocation5 + $0x198] sm:$0xff]   ;;  %v1771_v57 = vld [vmem:[#allocation5 + $0x1e0] sm:$0xff]   ;;  %v1775_v61 = vld [vmem:[#allocation5 + $0x1e8] sm:$0xff]  }
  0x5c   :  { %1489 = vmatpush3.bf16.msra.mxu0 %v1740_v18  ;;  %v1772_v58 = vld [vmem:[#allocation5 + $0x120] sm:$0xff]   ;;  %v1776_v62 = vld [vmem:[#allocation5 + $0x128] sm:$0xff]   ;;  %v1778_v0 = vld [vmem:[#allocation5 + $0x170] sm:$0xff]  }
  0x5d   :  { %1511 = vmatpush3.bf16.msra.mxu1 %v1741_v19  ;;  %1490 = vmatprep.subr.bf16.mxu0 %v1742_v20  ;;  %v1773_v59 = vld [vmem:[#allocation5 + $0x1a0] sm:$0xff]   ;;  %v1777_v63 = vld [vmem:[#allocation5 + $0x1a8] sm:$0xff]   ;;  %v1779_v1 = vld [vmem:[#allocation5 + $0x1f0] sm:$0xff]  }
  0x5e   :  { %1512 = vmatprep.subr.bf16.mxu1 %v1743_v21  ;;  %v1780_v2 = vld [vmem:[#allocation5 + $0x130] sm:$0xff]   ;;  %v1782_v4 = vld [vmem:[#allocation5 + $0x178] sm:$0xff]   ;;  %v80_v8 = vld [vmem:[#allocation2 + $0x28] sm:$0xff] }
  0x5f   :  { %v1781_v3 = vld [vmem:[#allocation5 + $0x1b0] sm:$0xff]   ;;  %v1783_v5 = vld [vmem:[#allocation5 + $0x1f8] sm:$0xff]   ;;  %v88_v10 = vpack.c.bf16 %v80_v8, %v80_v8  ;;  %v79_v12 = vld [vmem:[#allocation2 + $0x20] sm:$0xff] }
  0x60   :  { %1491 = vmatpush3.bf16.msra.mxu0 %v1744_v22  ;;  %v1784_v6 = vld [vmem:[#allocation5 + $0x138] sm:$0xff]   ;;  %v81_v13 = vld [vmem:[#allocation2 + $0x30] sm:$0xff]  ;;  %v87_v14 = vpack.c.bf16 %v79_v12, %v79_v12  ;;  %v1786_v16 = vld [vmem:[#allocation7] sm:$0xff]  }
  0x61   :  { %1513 = vmatpush3.bf16.msra.mxu1 %v1745_v23  ;;  %1492 = vmatprep.subr.bf16.mxu0 %v1746_v24  ;;  %v1785_v7 = vld [vmem:[#allocation5 + $0x1b8] sm:$0xff]   ;;  %v89_v15 = vpack.c.bf16 %v81_v13, %v81_v13  ;;  %v1787_v18 = vld [vmem:[#allocation7 + $0x8] sm:$0xff]   ;;  %v1788_v19 = vld [vmem:[#allocation7 + $0x10] sm:$0xff]  }
  0x62   :  { %1514 = vmatprep.subr.bf16.mxu1 %v1747_v25  ;;  %v82_v9 = vld [vmem:[#allocation2 + $0x38] sm:$0xff]  ;;  %v1790_v21 = vld [vmem:[#allocation7 + $0x20] sm:$0xff]   ;;  %v1791_v22 = vld [vmem:[#allocation7 + $0x28] sm:$0xff]  }
  0x63   :  { %v90_v11 = vpack.c.bf16 %v82_v9, %v82_v9  ;;  %v1789_v20 = vld [vmem:[#allocation7 + $0x18] sm:$0xff]   ;;  %v1792_v23 = vld [vmem:[#allocation7 + $0x30] sm:$0xff]   ;;  %v1794_v25 = vld [vmem:[#allocation7 + $0x40] sm:$0xff]  }
  0x64   :  { %1493 = vmatpush3.bf16.msra.mxu0 %v1748_v26  ;;  %v1793_v24 = vld [vmem:[#allocation7 + $0x38] sm:$0xff]   ;;  %v1795_v26 = vld [vmem:[#allocation7 + $0x48] sm:$0xff]  }
  0x65   :  { %1515 = vmatpush3.bf16.msra.mxu1 %v1749_v27  ;;  %1494 = vmatprep.subr.bf16.mxu0 %v1750_v28  ;;  %v1796_v27 = vld [vmem:[#allocation7 + $0x50] sm:$0xff]   ;;  %v220_v28 = vlaneseq }
  0x66   :  { %1516 = vmatprep.subr.bf16.mxu1 %v1751_v29 }
  0x67   :  { %v2074_v29 = vshrl.u32 %v220_v28, 7 }
  0x68   :  { %1495 = vmatpush3.bf16.msra.mxu0 %v1752_v30 }
  0x69   :  { %1517 = vmatpush3.bf16.msra.mxu1 %v1753_v31  ;;  %1524 = vmatprep.subr.bf16.mxu0 %v1754_v40  ;;  %v222_v30 = vsub.s32 0, %v2074_v29  ;;  %v2080_v31 = vld [vmem:[%s2142_s3] sm:$0x3f]  ;;  %s1968_s3 = smov [#allocation10]  }
  0x6a   :  { %1546 = vmatprep.subr.bf16.mxu1 %v1755_v41  ;;  %s1365_s29 = sshll.u32 %s1968_s3, 4  ;;  %s1366_s29 = int_to_ptr.vmem [resolvable:$true] %s1365_s29 }
  0x6b   :  { %641 = vmatmul.mubr.bf16.vlgmr.msra.gmra.mrb[0].mxu0 %v83_v37  ;;  %v223_v34 = vrot.slane %v2080_v31, %v222_v30  ;;  %v1812_v30 = vld [vmem:[#allocation7 + $0xd0] sm:$0xff]   ;;  %s1930_s17 = scalar_lea.vmem %s1366_s29, 128  ;;  %p1935_p5 = scmp.lt.s32.totalorder %s1366_s29, %s1366_s29 }
  0x6c   :  { %681 = vmatmul.mubr.bf16.vlgmr.msra.gmra.mrb[0].mxu1 %v85_v39  ;;  %1525 = vmatpush3.bf16.msra.mxu0 %v1756_v42  ;;  %p1931_p4 = scmp.ne.s32.totalorder %s1366_s29, %s1930_s17  ;;  %p1936_p6 = scmp.lt.s32.totalorder %s1930_s17, %s1930_s17 }
  0x6d   :  { %1547 = vmatpush3.bf16.msra.mxu1 %v1757_v43  ;;  %1526 = vmatprep.subr.bf16.mxu0 %v1758_v44 }
  0x6e   :  { %1548 = vmatprep.subr.bf16.mxu1 %v1759_v45  ;;  %720 = vmatprep.mubr.bf16.mxu0 %v88_v10  ;;  %p1937_p7 = por %p1936_p6, %p1935_p5 }
  0x6f   :  { %760 = vmatprep.mubr.bf16.mxu1 %v90_v11 }
  0x70   :  { %1527 = vmatpush3.bf16.msra.mxu0 %v1760_v46  ;;  %p1938_p8 = pnand %p1937_p7, %p1931_p4 }
  0x71   :  { %1549 = vmatpush3.bf16.msra.mxu1 %v1761_v47  ;;  %1528 = vmatprep.subr.bf16.mxu0 %v1762_v48 }
  0x72   :  { %1550 = vmatprep.subr.bf16.mxu1 %v1763_v49 }
  0x74   :  { %1529 = vmatpush3.bf16.msra.mxu0 %v1764_v50 }
  0x75   :  { %1551 = vmatpush3.bf16.msra.mxu1 %v1765_v51  ;;  %1530 = vmatprep.subr.bf16.mxu0 %v1766_v52 }
  0x76   :  { %1552 = vmatprep.subr.bf16.mxu1 %v1767_v53 }
  0x78   :  { %1531 = vmatpush3.bf16.msra.mxu0 %v1768_v54 }
  0x79   :  { %1553 = vmatpush3.bf16.msra.mxu1 %v1769_v55  ;;  %1532 = vmatprep.subr.bf16.mxu0 %v1770_v56 }
  0x7a   :  { %1554 = vmatprep.subr.bf16.mxu1 %v1771_v57 }
  0x7c   :  { %1533 = vmatpush3.bf16.msra.mxu0 %v1772_v58 }
  0x7d   :  { %1555 = vmatpush3.bf16.msra.mxu1 %v1773_v59  ;;  %1534 = vmatprep.subr.bf16.mxu0 %v1774_v60 }
  0x7e   :  { %1556 = vmatprep.subr.bf16.mxu1 %v1775_v61 }
  0x80   :  { %1535 = vmatpush3.bf16.msra.mxu0 %v1776_v62 }
  0x81   :  { %1557 = vmatpush3.bf16.msra.mxu1 %v1777_v63  ;;  %1536 = vmatprep.subr.bf16.mxu0 %v1778_v0  ;;  %v1797_v63 = vld [vmem:[#allocation7 + $0x58] sm:$0xff]   ;;  %v1798_v0 = vld [vmem:[#allocation7 + $0x60] sm:$0xff]  }
  0x82   :  { %1558 = vmatprep.subr.bf16.mxu1 %v1779_v1  ;;  %v1799_v1 = vld [vmem:[#allocation7 + $0x68] sm:$0xff]  }
  0x84   :  { %1537 = vmatpush3.bf16.msra.mxu0 %v1780_v2  ;;  %v1800_v2 = vld [vmem:[#allocation7 + $0x70] sm:$0xff]  }
  0x85   :  { %1559 = vmatpush3.bf16.msra.mxu1 %v1781_v3  ;;  %1538 = vmatprep.subr.bf16.mxu0 %v1782_v4  ;;  %v1801_v3 = vld [vmem:[#allocation7 + $0x78] sm:$0xff]   ;;  %v1802_v4 = vld [vmem:[#allocation7 + $0x80] sm:$0xff]  }
  0x86   :  { %1560 = vmatprep.subr.bf16.mxu1 %v1783_v5  ;;  %v1803_v5 = vld [vmem:[#allocation7 + $0x88] sm:$0xff]  }
  0x88   :  { %1539 = vmatpush3.bf16.msra.mxu0 %v1784_v6  ;;  %v1804_v6 = vld [vmem:[#allocation7 + $0x90] sm:$0xff]  }
  0x89   :  { %1561 = vmatpush3.bf16.msra.mxu1 %v1785_v7  ;;  %1613 = vmatprep.subr.bf16.mxu0 %v1966_v17  ;;  %v792_v7 = vsub.s32 1, %v2074_v29 }
  0x8a   :  { %1633 = vmatprep.subr.bf16.mxu1 %v1966_v17 }
  0x8b   :  { %721 = vmatmul.mubr.bf16.vlgmr.msra.gmra.mrb[4].mxu0 %v87_v14  ;;  %v793_v8 = vrot.slane %v2080_v31, %v792_v7  ;;  %v1137_v7 = vsub.s32 4, %v2074_v29 }
  0x8c   :  { %761 = vmatmul.mubr.bf16.vlgmr.msra.gmra.mrb[4].mxu1 %v89_v15  ;;  %1614 = vmatpush3.bf16.msra.mxu0 %v1786_v16 }
  0x8d   :  { %1615 = vmatprep.subr.bf16.mxu0 %v1966_v17  ;;  %1629 = vmatprep.mubr.msk.bf16.mxu0 %vm1967_vm0, %v1966_v17 }
  0x8e   :  { %1649 = vmatprep.mubr.msk.bf16.mxu1 %vm1967_vm0, %v1966_v17  ;;  %1634 = vmatpush3.bf16.msra.mxu1 %v1794_v25  ;;  %v1809_v25 = vld [vmem:[#allocation7 + $0xb8] sm:$0xff]  }
  0x8f   :  { %1635 = vmatprep.subr.bf16.mxu1 %v1966_v17 }
  0x90   :  { %1616 = vmatpush3.bf16.msra.mxu0 %v1787_v18 }
  0x91   :  { %1617 = vmatprep.subr.bf16.mxu0 %v1966_v17 }
  0x92   :  { %1636 = vmatpush3.bf16.msra.mxu1 %v1795_v26  ;;  %v1810_v26 = vld [vmem:[#allocation7 + $0xc0] sm:$0xff]  }
  0x93   :  { %1637 = vmatprep.subr.bf16.mxu1 %v1966_v17 }
  0x94   :  { %1618 = vmatpush3.bf16.msra.mxu0 %v1788_v19 }
  0x95   :  { %1619 = vmatprep.subr.bf16.mxu0 %v1966_v17 }
  0x96   :  { %1638 = vmatpush3.bf16.msra.mxu1 %v1796_v27  ;;  %v1811_v27 = vld [vmem:[#allocation7 + $0xc8] sm:$0xff]  }
  0x97   :  { %1639 = vmatprep.subr.bf16.mxu1 %v1966_v17 }
  0x98   :  { %1620 = vmatpush3.bf16.msra.mxu0 %v1789_v20 }
  0x99   :  { %1621 = vmatprep.subr.bf16.mxu0 %v1966_v17 }
  0x9a   :  { %1640 = vmatpush3.bf16.msra.mxu1 %v1797_v63 }
  0x9b   :  { %1641 = vmatprep.subr.bf16.mxu1 %v1966_v17 }
  0x9c   :  { %1622 = vmatpush3.bf16.msra.mxu0 %v1790_v21  ;;  %v1805_v21 = vld [vmem:[#allocation7 + $0x98] sm:$0xff]  }
  0x9d   :  { %1623 = vmatprep.subr.bf16.mxu0 %v1966_v17 }
  0x9e   :  { %1642 = vmatpush3.bf16.msra.mxu1 %v1798_v0 }
  0x9f   :  { %1643 = vmatprep.subr.bf16.mxu1 %v1966_v17 }
  0xa0   :  { %1624 = vmatpush3.bf16.msra.mxu0 %v1791_v22  ;;  %v1806_v22 = vld [vmem:[#allocation7 + $0xa0] sm:$0xff]  }
  0xa1   :  { %1625 = vmatprep.subr.bf16.mxu0 %v1966_v17 }
  0xa2   :  { %1644 = vmatpush3.bf16.msra.mxu1 %v1799_v1 }
  0xa3   :  { %1645 = vmatprep.subr.bf16.mxu1 %v1966_v17 }
  0xa4   :  { %1626 = vmatpush3.bf16.msra.mxu0 %v1792_v23  ;;  %v1807_v23 = vld [vmem:[#allocation7 + $0xa8] sm:$0xff]  }
  0xa5   :  { %1627 = vmatprep.subr.bf16.mxu0 %v1966_v17 }
  0xa6   :  { %1646 = vmatpush3.bf16.msra.mxu1 %v1800_v2  ;;  %v1821_v2 = vld [vmem:[#allocation8 + $0x18] sm:$0xff]  }
  0xa7   :  { %1647 = vmatprep.subr.bf16.mxu1 %v1966_v17 }
  0xa8   :  { %1628 = vmatpush3.bf16.msra.mxu0 %v1793_v24  ;;  %v1808_v24 = vld [vmem:[#allocation7 + $0xb0] sm:$0xff]  }
  0xa9   :  { %1653 = vmatprep.subr.bf16.mxu0 %v1966_v17 }
  0xaa   :  { %1648 = vmatpush3.bf16.msra.mxu1 %v1801_v3  ;;  %v1822_v3 = vld [vmem:[#allocation8 + $0x20] sm:$0xff]  }
  0xab   :  { %1673 = vmatprep.subr.bf16.mxu1 %v1966_v17 }
 0x13e   :  { %v1496_v32 = vpop.f32.mrb[0].mxu0 }
 0x13f   :  { %v1518_v33 = vpop.f32.mrb[0].mxu1  ;;  %v1497_v35 = vpop.f32.mrb[1].mxu0 }
 0x140   :  { %v1519_v36 = vpop.f32.mrb[1].mxu1  ;;  %v1498_v37 = vadd.f32 %v1497_v35, %v1496_v32  ;;  %v1499_v39 = vpop.f32.mrb[2].mxu0  ;;  %v907_v32 = vsub.s32 2, %v2074_v29 }
 0x141   :  { %v1520_v38 = vadd.f32 %v1519_v36, %v1518_v33  ;;  %v1521_v40 = vpop.f32.mrb[2].mxu1  ;;  %v1500_v41 = vpop.f32.mrb[3].mxu0 }
 0x142   :  { %v1522_v42 = vpop.f32.mrb[3].mxu1  ;;  %v643_v43 = vadd.f32 %v1498_v37, %v223_v34  ;;  %v908_v33 = vrot.slane %v2080_v31, %v907_v32 }
 0x144   :  { %v683_v44 = vadd.f32 %v1520_v38, %v643_v43 }
 0x15e   :  { %v1540_v45 = vpop.f32.mrb[4].mxu0 }
 0x15f   :  { %v1562_v46 = vpop.f32.mrb[4].mxu1  ;;  %v1541_v47 = vpop.f32.mrb[5].mxu0 }
 0x160   :  { %v1542_v48 = vadd.f32 %v1541_v47, %v1540_v45  ;;  %v1563_v49 = vpop.f32.mrb[5].mxu1  ;;  %v1543_v50 = vpop.f32.mrb[6].mxu0  ;;  %v1813_v45 = vld [vmem:[#allocation7 + $0xd8] sm:$0xff]   ;;  %v1815_v47 = vld [vmem:[#allocation7 + $0xe8] sm:$0xff]  }
 0x161   :  { %v1564_v51 = vadd.f32 %v1563_v49, %v1562_v46  ;;  %v1565_v52 = vpop.f32.mrb[6].mxu1  ;;  %v1544_v53 = vpop.f32.mrb[7].mxu0  ;;  %v1814_v46 = vld [vmem:[#allocation7 + $0xe0] sm:$0xff]   ;;  %v1817_v49 = vld [vmem:[#allocation7 + $0xf8] sm:$0xff]  }
 0x162   :  { %v723_v54 = vadd.f32 %v1542_v48, %v683_v44  ;;  %v1566_v55 = vpop.f32.mrb[7].mxu1  ;;  %v1816_v48 = vld [vmem:[#allocation7 + $0xf0] sm:$0xff]   ;;  %v1818_v50 = vld [vmem:[#allocation8] sm:$0xff]   ;;  %v1022_v53 = vsub.s32 3, %v2074_v29 }
 0x163   :  { %v1820_v52 = vld [vmem:[#allocation8 + $0x10] sm:$0xff]  }
 0x164   :  { %v763_v56 = vadd.f32 %v1564_v51, %v723_v54  ;;  %v1819_v51 = vld [vmem:[#allocation8 + $0x8] sm:$0xff]   ;;  %v1023_v54 = vrot.slane %v2080_v31, %v1022_v53 }
 0x166   :  { %v769_v57 = vmul.f32 0.70710677, %v763_v56  ;;  %v768_v59 = vmul.f32 0.5, %v763_v56 }
 0x168   :  { %1826 = verf.f32 %v769_v57 }
 0x172   :  { %v1827_v58 = vpop.eup %1826 }
 0x173   :  { %v771_v60 = vadd.f32 1.0, %v1827_v58 }
 0x175   :  { %v772_v61 = vmul.f32 %v771_v60, %v768_v59 }
 0x177   :  { %v773_v62 = vpack.c.bf16 %v772_v61, %v772_v61 }
 0x179   :  { %1630 = vmatmul.mubr.bf16.vlgmr.msra.gmra.mrb[8].mxu0 %v773_v62 }
 0x17a   :  { %1669 = vmatprep.mubr.msk.bf16.mxu0 %vm1967_vm0, %v1966_v17  ;;  %1654 = vmatpush3.bf16.msra.mxu0 %v1802_v4  ;;  %v1823_v4 = vld [vmem:[#allocation8 + $0x28] sm:$0xff]  }
 0x17b   :  { %1655 = vmatprep.subr.bf16.mxu0 %v1966_v17 }
 0x17e   :  { %1656 = vmatpush3.bf16.msra.mxu0 %v1803_v5  ;;  %v1824_v5 = vld [vmem:[#allocation8 + $0x30] sm:$0xff]  }
 0x17f   :  { %1657 = vmatprep.subr.bf16.mxu0 %v1966_v17 }
 0x182   :  { %1658 = vmatpush3.bf16.msra.mxu0 %v1804_v6  ;;  %v1825_v6 = vld [vmem:[#allocation8 + $0x38] sm:$0xff]  }
 0x183   :  { %1659 = vmatprep.subr.bf16.mxu0 %v1966_v17 }
 0x186   :  { %1660 = vmatpush3.bf16.msra.mxu0 %v1805_v21  ;;  %v1342_v21 = vand.u32 127, %v220_v28 }
 0x187   :  { %1661 = vmatprep.subr.bf16.mxu0 %v1966_v17 }
 0x188   :  { %vm1343_vm1 = vcmp.lt.s32.totalorder %v1342_v21, 8  ;;  %vm1344_vm2 = vcmp.eq.s32.totalorder %v1342_v21, 8 }
 0x18a   :  { %1662 = vmatpush3.bf16.msra.mxu0 %v1806_v22 }
 0x18b   :  { %1663 = vmatprep.subr.bf16.mxu0 %v1966_v17 }
 0x18e   :  { %1664 = vmatpush3.bf16.msra.mxu0 %v1807_v23 }
 0x18f   :  { %1665 = vmatprep.subr.bf16.mxu0 %v1966_v17 }
 0x192   :  { %1666 = vmatpush3.bf16.msra.mxu0 %v1808_v24 }
 0x193   :  { %1667 = vmatprep.subr.bf16.mxu0 %v1966_v17 }
 0x196   :  { %1668 = vmatpush3.bf16.msra.mxu0 %v1809_v25 }
 0x197   :  { %1693 = vmatprep.subr.bf16.mxu0 %v1966_v17 }
 0x24c   :  { %v876_v9 = vpop.f32.mrb[8].mxu0 }
 0x24d   :  { %v877_v10 = vadd.f32 %v876_v9, %v793_v8  ;;  %v1631_v11 = vpop.f32.mrb[9].mxu0  ;;  %v1138_v8 = vrot.slane %v2080_v31, %v1137_v7 }
 0x24e   :  { %v879_v12 = vpop.f32.mrb[10].mxu0 }
 0x24f   :  { %v883_v13 = vmul.f32 0.70710677, %v877_v10  ;;  %v1632_v14 = vpop.f32.mrb[11].mxu0  ;;  %v882_v16 = vmul.f32 0.5, %v877_v10 }
 0x251   :  { %1828 = verf.f32 %v883_v13 }
 0x25b   :  { %v1829_v15 = vpop.eup %1828 }
 0x25c   :  { %v885_v18 = vadd.f32 1.0, %v1829_v15 }
 0x25e   :  { %v886_v19 = vmul.f32 %v885_v18, %v882_v16 }
 0x260   :  { %v887_v20 = vpack.c.bf16 %v886_v19, %v886_v19 }
 0x262   :  { %1650 = vmatmul.mubr.bf16.vlgmr.msra.gmra.mrb[8].mxu1 %v887_v20 }
 0x263   :  { %1689 = vmatprep.mubr.msk.bf16.mxu1 %vm1967_vm0, %v1966_v17  ;;  %1674 = vmatpush3.bf16.msra.mxu1 %v1810_v26 }
 0x264   :  { %1675 = vmatprep.subr.bf16.mxu1 %v1966_v17 }
 0x267   :  { %1676 = vmatpush3.bf16.msra.mxu1 %v1811_v27 }
 0x268   :  { %1677 = vmatprep.subr.bf16.mxu1 %v1966_v17 }
 0x26b   :  { %1678 = vmatpush3.bf16.msra.mxu1 %v1812_v30 }
 0x26c   :  { %1679 = vmatprep.subr.bf16.mxu1 %v1966_v17 }
 0x26f   :  { %1680 = vmatpush3.bf16.msra.mxu1 %v1813_v45 }
 0x270   :  { %1681 = vmatprep.subr.bf16.mxu1 %v1966_v17 }
 0x273   :  { %1682 = vmatpush3.bf16.msra.mxu1 %v1814_v46 }
 0x274   :  { %1683 = vmatprep.subr.bf16.mxu1 %v1966_v17 }
 0x277   :  { %1684 = vmatpush3.bf16.msra.mxu1 %v1815_v47 }
 0x278   :  { %1685 = vmatprep.subr.bf16.mxu1 %v1966_v17 }
 0x27b   :  { %1686 = vmatpush3.bf16.msra.mxu1 %v1816_v48 }
 0x27c   :  { %1687 = vmatprep.subr.bf16.mxu1 %v1966_v17 }
 0x27f   :  { %1688 = vmatpush3.bf16.msra.mxu1 %v1817_v49 }
 0x335   :  { %v991_v34 = vpop.f32.mrb[8].mxu1 }
 0x336   :  { %v992_v35 = vadd.f32 %v991_v34, %v908_v33  ;;  %v1651_v36 = vpop.f32.mrb[9].mxu1 }
 0x337   :  { %v994_v37 = vpop.f32.mrb[10].mxu1 }
 0x338   :  { %v998_v38 = vmul.f32 0.70710677, %v992_v35  ;;  %v1652_v39 = vpop.f32.mrb[11].mxu1  ;;  %v997_v41 = vmul.f32 0.5, %v992_v35 }
 0x33a   :  { %1830 = verf.f32 %v998_v38 }
 0x344   :  { %v1831_v40 = vpop.eup %1830 }
 0x345   :  { %v1000_v42 = vadd.f32 1.0, %v1831_v40 }
 0x347   :  { %v1001_v43 = vmul.f32 %v1000_v42, %v997_v41 }
 0x349   :  { %v1002_v44 = vpack.c.bf16 %v1001_v43, %v1001_v43 }
 0x34b   :  { %1670 = vmatmul.mubr.bf16.vlgmr.msra.gmra.mrb[12].mxu0 %v1002_v44 }
 0x34c   :  { %1709 = vmatprep.mubr.msk.bf16.mxu0 %vm1967_vm0, %v1966_v17  ;;  %1694 = vmatpush3.bf16.msra.mxu0 %v1818_v50 }
 0x34d   :  { %1695 = vmatprep.subr.bf16.mxu0 %v1966_v17 }
 0x350   :  { %1696 = vmatpush3.bf16.msra.mxu0 %v1819_v51 }
 0x351   :  { %1697 = vmatprep.subr.bf16.mxu0 %v1966_v17 }
 0x354   :  { %1698 = vmatpush3.bf16.msra.mxu0 %v1820_v52 }
 0x355   :  { %1699 = vmatprep.subr.bf16.mxu0 %v1966_v17 }
 0x358   :  { %1700 = vmatpush3.bf16.msra.mxu0 %v1821_v2 }
 0x359   :  { %1701 = vmatprep.subr.bf16.mxu0 %v1966_v17 }
 0x35c   :  { %1702 = vmatpush3.bf16.msra.mxu0 %v1822_v3 }
 0x35d   :  { %1703 = vmatprep.subr.bf16.mxu0 %v1966_v17 }
 0x360   :  { %1704 = vmatpush3.bf16.msra.mxu0 %v1823_v4 }
 0x361   :  { %1705 = vmatprep.subr.bf16.mxu0 %v1966_v17 }
 0x364   :  { %1706 = vmatpush3.bf16.msra.mxu0 %v1824_v5 }
 0x365   :  { %1707 = vmatprep.subr.bf16.mxu0 %v1966_v17  ;;  %v1251_v17 = vsub.s32 5, %v2074_v29 }
 0x367   :  { %v1252_v22 = vrot.slane %v2080_v31, %v1251_v17 }
 0x368   :  { %1708 = vmatpush3.bf16.msra.mxu0 %v1825_v6 }
 0x41e   :  { %v1106_v55 = vpop.f32.mrb[12].mxu0 }
 0x41f   :  { %v1107_v56 = vadd.f32 %v1106_v55, %v1023_v54  ;;  %v1671_v57 = vpop.f32.mrb[13].mxu0 }
 0x420   :  { %v1109_v58 = vpop.f32.mrb[14].mxu0 }
 0x421   :  { %v1113_v59 = vmul.f32 0.70710677, %v1107_v56  ;;  %v1672_v60 = vpop.f32.mrb[15].mxu0  ;;  %v1112_v62 = vmul.f32 0.5, %v1107_v56 }
 0x423   :  { %1832 = verf.f32 %v1113_v59 }
 0x42d   :  { %v1833_v61 = vpop.eup %1832 }
 0x42e   :  { %v1115_v63 = vadd.f32 1.0, %v1833_v61 }
 0x430   :  { %v1116_v0 = vmul.f32 %v1115_v63, %v1112_v62 }
 0x432   :  { %v1117_v1 = vpack.c.bf16 %v1116_v0, %v1116_v0 }
 0x434   :  { %1690 = vmatmul.mubr.bf16.vlgmr.msra.gmra.mrb[12].mxu1 %v1117_v1 }
 0x507   :  { %v1221_v9 = vpop.f32.mrb[12].mxu1 }
 0x508   :  { %v1222_v10 = vadd.f32 %v1221_v9, %v1138_v8  ;;  %v1691_v11 = vpop.f32.mrb[13].mxu1 }
 0x509   :  { %v1224_v12 = vpop.f32.mrb[14].mxu1 }
 0x50a   :  { %v1228_v13 = vmul.f32 0.70710677, %v1222_v10  ;;  %v1692_v14 = vpop.f32.mrb[15].mxu1  ;;  %v1227_v16 = vmul.f32 0.5, %v1222_v10 }
 0x50c   :  { %1834 = verf.f32 %v1228_v13 }
 0x516   :  { %v1835_v15 = vpop.eup %1834 }
 0x517   :  { %v1230_v18 = vadd.f32 1.0, %v1835_v15 }
 0x519   :  { %v1231_v19 = vmul.f32 %v1230_v18, %v1227_v16 }
 0x51b   :  { %v1232_v20 = vpack.c.bf16 %v1231_v19, %v1231_v19 }
 0x51d   :  { %1710 = vmatmul.mubr.bf16.vlgmr.msra.gmra.mrb[16].mxu0 %v1232_v20 }
 0x5f0   :  { %v1335_v23 = vpop.f32.mrb[16].mxu0 }
 0x5f1   :  { %v1336_v24 = vadd.f32 %v1335_v23, %v1252_v22  ;;  %v1711_v25 = vpop.f32.mrb[17].mxu0 }
 0x5f2   :  { %v1338_v26 = vpop.f32.mrb[18].mxu0 }
 0x5f3   :  { %v1712_v27 = vpop.f32.mrb[19].mxu0  ;;  %v1345_v30 = vsel %vm1343_vm1, %v1336_v24, -1e+30 }
 0x5f4   :  { %1346 = vmax.xlane.f32.xlu0 %v1345_v30 }
 0x681   :  { %v1347_v32 = vpop.xlane.xlu0 %1346 }
 0x682   :  { %v1348_v33 = vsub.f32 %v1345_v30, %v1347_v32 }
 0x684   :  { %v1349_v34 = vmul.f32 1.442695, %v1348_v33 }
 0x686   :  { %1836 = vpow2.f32 %v1349_v34 }
 0x690   :  { %v1837_v35 = vpop.eup %1836 }
 0x691   :  { %1351 = vadd.xlane.f32.xlu0 %v1837_v35 }
 0x71e   :  { %v1352_v36 = vpop.xlane.xlu0 %1351 }
 0x71f   :  { %1838 = vrcp.f32 %v1352_v36 }
 0x720   :  { %1840 = vtanh.f32 %v1336_v24 }
 0x729   :  { %v1839_v28 = vpop.eup %1838 }
 0x72a   :  { %v1355_v29 = vmul.f32 %v1839_v28, %v1837_v35  ;;  %v1841_v31 = vpop.eup %1840 }
 0x72c   :  { %v1357_v37 = vsel %vm1344_vm2, %v1841_v31, %v1355_v29 }
 0x72d   :  { %1358 = vst [vmem:[#allocation10] sm:$0xff] %v1357_v37 }
 0x72e   :  { %1941 = shalt.err (!%p1938_p8)
}
 0x72f   :  { %s1942_s19 = scalar_lea.hbm %s2144_s5, 128 }
 0x730   :  { %p1943_p9 = scmp.ne.s32.totalorder %s2144_s5, %s1942_s19  ;;  %p1946_p10 = scmp.lt.u32.totalorder %s1942_s19, %s2144_s5 }
 0x732   :  { %p1948_p11 = pnand %p1946_p10, %p1943_p9 }
 0x734   :  { %1951 = shalt.err (!%p1948_p11)
}
 0x735   :  { %1368 = dma.vmem_to_hbm [thread:$0]  %s1366_s29, 128, %s2144_s5, [#allocation4]  }
 0x736   :  { %1958 = dma.done.wait [#allocation4], 128  }
 0x737   :  { %1959 = vsyncadd [#allocation4], 4294967168 }
 0x738   :  { %1372 = vsyncpa [#allocation3], 1 }
 0x739   :  { %1373 = vsyncpa [#allocation6], 1 }
 0x73a   :  { %1374 = vsyncpa [#allocation9], 1 }
 0x73b   :  { %1375 = vsyncpa [#allocation4], 1 }

</bundles_post_ra>
